<compile_context>
chip_gen: v5e
topology: v5e:2x2
jax: 0.10.0
libtpu: 0.0.40
codegen_flags: <defaults>
</compile_context>

<pallas_src>
import functools

import jax
import jax.numpy as jnp
from jax.experimental import pallas as pl
from jax.experimental.pallas import tpu as pltpu


def _total_loss_kernel(x_ref, y_ref, out_ref,
                       sx_ref, sy_ref, sxx_ref, syy_ref, sxy_ref, sdd_ref,
                       *, n_true, n_cols, loss_param):
    """Streaming-moment accumulation over [C, block_n] tiles; finalize on last step."""
    step = pl.program_id(0)
    need_mse = "MSE" in loss_param
    need_obj = "ObjectiveFunction" in loss_param

    @pl.when(step == 0)
    def _init():
        sx_ref[...] = jnp.zeros_like(sx_ref)
        sy_ref[...] = jnp.zeros_like(sy_ref)
        sxx_ref[...] = jnp.zeros_like(sxx_ref)
        syy_ref[...] = jnp.zeros_like(syy_ref)
        sxy_ref[...] = jnp.zeros_like(sxy_ref)
        sdd_ref[...] = jnp.zeros_like(sdd_ref)

    x = x_ref[...].astype(jnp.float32)   # [C, block_n]  (lane-dense)
    y = y_ref[...].astype(jnp.float32)   # [C, block_n]

    # Accumulate raw moments. Zero-padded lanes contribute 0 to every sum,
    # and all divisions use the true N, so padding is exact.
    if need_mse:
        d = x - y
        sdd_ref[...] += jnp.sum(d * d, axis=1, keepdims=True)
    if need_obj:
        sx_ref[...] += jnp.sum(x, axis=1, keepdims=True)
        sy_ref[...] += jnp.sum(y, axis=1, keepdims=True)
        sxx_ref[...] += jnp.sum(x * x, axis=1, keepdims=True)
        syy_ref[...] += jnp.sum(y * y, axis=1, keepdims=True)
        sxy_ref[...] += jnp.sum(x * y, axis=1, keepdims=True)

    @pl.when(step == pl.num_programs(0) - 1)
    def _finalize():
        inv_n = jnp.float32(1.0 / n_true)              # hoisted trace-time constant
        total = jnp.float32(0.0)

        if need_mse:
            # nn.MSELoss() default reduction='mean' over ALL N*C elements.
            mse = jnp.sum(sdd_ref[...]) * jnp.float32(1.0 / (n_true * n_cols))
            total = total + jnp.float32(loss_param["MSE"]["w"]) * mse

        if need_obj:
            sx, sy = sx_ref[...], sy_ref[...]          # [C, 1]
            sxx, syy, sxy = sxx_ref[...], syy_ref[...], sxy_ref[...]
            mx = sx * inv_n
            my = sy * inv_n
            # get_var(x, mean) = sum((x^2 - mean^2)/N) = sum(x^2)/N - mean^2
            var_x = sxx * inv_n - mx * mx
            var_y = syy * inv_n - my * my
            # mean((x - mx)(y - my)) = sum(xy)/N - mx*my   (exact identity)
            cov = sxy * inv_n - mx * my
            l = 1.0 - 2.0 * cov / (var_x + var_y + (mx - my) ** 2)   # [C, 1]
            # Columns 0 ("v") and 1 ("a") only; weight intentionally NOT applied
            # (matches the PyTorch reference).
            total = total + (l[0, 0] + l[1, 0]) * jnp.float32(0.5)

        # Lane-dense scalar writeback: full (1, 128) row; wrapper reads [0, 0].
        out_ref[...] = jnp.broadcast_to(total, (1, 128))


def total_loss_pallas(logits, targets, loss_param, *, block_n=None):
    """Pallas wrapper: returns scalar total loss (float32)."""
    assert logits.shape == targets.shape and logits.ndim == 2
    N, C = logits.shape
    loss_types = list(loss_param.keys())
    if "ObjectiveFunction" in loss_types:
        assert C >= 2, "ObjectiveFunction needs at least 2 channels (v, a)."

    # Lane-dense layout: [C, N] so N lives on lanes. (Layout plumbing in wrapper.)
    xt = logits.T
    yt = targets.T

    itemsize = jnp.dtype(logits.dtype).itemsize
    if block_n is None:
        # ~2 MiB per input per pipeline buffer => 2 inputs x 2 buffers ~= 8 MiB,
        # comfortably under v5e's 16 MiB scoped default and v7x's 64 MiB VMEM.
        vmem_budget = 2 * 1024 * 1024
        cap = max(128, (vmem_budget // (C * itemsize)) // 128 * 128)
        block_n = min(cap, -(-N // 128) * 128)
    block_n = max(128, (block_n // 128) * 128)

    num_blocks = pl.cdiv(N, block_n)
    n_padded = num_blocks * block_n
    if n_padded != N:
        pad = n_padded - N
        xt = jnp.pad(xt, ((0, 0), (0, pad)))   # zero padding is exact for raw moments
        yt = jnp.pad(yt, ((0, 0), (0, pad)))

    kernel = functools.partial(_total_loss_kernel,
                               n_true=N, n_cols=C, loss_param=loss_param)

    out = pl.pallas_call(
        kernel,
        out_shape=jax.ShapeDtypeStruct((1, 128), jnp.float32),
        grid_spec=pltpu.PrefetchScalarGridSpec(
            num_scalar_prefetch=0,
            grid=(num_blocks,),
            in_specs=[
                pl.BlockSpec((C, block_n), lambda i: (0, i)),
                pl.BlockSpec((C, block_n), lambda i: (0, i)),
            ],
            out_specs=pl.BlockSpec((1, 128), lambda i: (0, 0)),
            scratch_shapes=[pltpu.VMEM((C, 1), jnp.float32)] * 6,
        ),
        compiler_params=pltpu.CompilerParams(
            dimension_semantics=("arbitrary",)),   # reduction axis
    )(xt, yt)
    return out[0, 0]


def total_loss_ref(logits, targets, loss_param):
    """Pure-JAX reference mirroring the PyTorch forward exactly."""
    x = logits.astype(jnp.float32)
    y = targets.astype(jnp.float32)
    total = jnp.float32(0.0)
    loss_types = list(loss_param.keys())
    if "MSE" in loss_types:
        total = total + jnp.float32(loss_param["MSE"]["w"]) * jnp.mean((x - y) ** 2)
    if "ObjectiveFunction" in loss_types:
        def get_var(v, mean):
            return jnp.sum((v ** 2 - mean ** 2) / v.shape[0])

        def calc_l(a, b):
            ma, mb = jnp.mean(a), jnp.mean(b)
            va, vb = get_var(a, ma), get_var(b, mb)
            cov = jnp.mean((a - ma) * (b - mb))
            return 1.0 - 2.0 * cov / (va + vb + (ma - mb) ** 2)

        total = total + (calc_l(x[:, 0], y[:, 0]) + calc_l(x[:, 1], y[:, 1])) / 2.0
    return total


def total_loss(logits, targets, loss_param, *, min_pallas_elems=1 << 14):
    """Convenience dispatcher: tiny inputs go to the fused pure-JAX path."""
    if logits.shape[0] * logits.shape[1] < min_pallas_elems:
        return total_loss_ref(logits, targets, loss_param)
    return total_loss_pallas(logits, targets, loss_param)


if __name__ == "__main__":
    loss_param = {"MSE": {"w": 1.0}, "ObjectiveFunction": {"w": 1.0}}

    key = jax.random.PRNGKey(0)
    k1, k2, k3, k4 = jax.random.split(key, 4)

    # Config 1: C=2, N=2048, small block_n to exercise the multi-step grid +
    # init/finalize accumulation path.
    N, C = 2048, 2
    logits = jax.random.normal(k1, (N, C), dtype=jnp.float32)
    targets = jax.random.normal(k2, (N, C), dtype=jnp.float32)
    out = total_loss_pallas(logits, targets, loss_param, block_n=512)
    out = jax.block_until_ready(out)
    ref = total_loss_ref(logits, targets, loss_param)
    assert jnp.allclose(out, ref, rtol=1e-4, atol=1e-5), (out, ref)

    # Config 2: ragged N (exercises zero-padding) and C=3 (MSE over all columns,
    # concordance still over columns 0 and 1 only).
    N2, C2 = 300, 3
    logits2 = jax.random.normal(k3, (N2, C2), dtype=jnp.float32)
    targets2 = jax.random.normal(k4, (N2, C2), dtype=jnp.float32)
    out2 = total_loss_pallas(logits2, targets2, loss_param, block_n=128)
    out2 = jax.block_until_ready(out2)
    ref2 = total_loss_ref(logits2, targets2, loss_param)
    assert jnp.allclose(out2, ref2, rtol=1e-4, atol=1e-5), (out2, ref2)

    print("KERNEL_OK")
</pallas_src>

<mosaic_0001>
module attributes {stable_mosaic.version = 11 : i64} {
  func.func @_total_loss_kernel(%arg0: i32, %arg1: memref<2x512xf32, #tpu.memory_space<vmem>>, %arg2: memref<2x512xf32, #tpu.memory_space<vmem>>, %arg3: memref<1x128xf32, #tpu.memory_space<vmem>>, %arg4: memref<2x1xf32, #tpu.memory_space<vmem>>, %arg5: memref<2x1xf32, #tpu.memory_space<vmem>>, %arg6: memref<2x1xf32, #tpu.memory_space<vmem>>, %arg7: memref<2x1xf32, #tpu.memory_space<vmem>>, %arg8: memref<2x1xf32, #tpu.memory_space<vmem>>, %arg9: memref<2x1xf32, #tpu.memory_space<vmem>>) attributes {dimension_semantics = [#tpu.dimension_semantics<arbitrary>], iteration_bounds = array<i64: 4>, scalar_prefetch = 0 : i64, scratch_operands = 6 : i64, tpu.core_type = #tpu.core_type<tc>, window_params = [{transform_indices = @transform_0, window_bounds = array<i64: 2, 512>}, {transform_indices = @transform_1, window_bounds = array<i64: 2, 512>}, {pipeline_mode = #tpu.pipeline_mode<synchronous>, transform_indices = @transform_2, window_bounds = array<i64: 1, 128>}]} {
    %c0_i32 = arith.constant 0 : i32
    %0 = arith.cmpi eq, %arg0, %c0_i32 : i32
    %1 = arith.extui %0 : i1 to i32
    %c0_i32_0 = arith.constant 0 : i32
    %2 = arith.cmpi ne, %1, %c0_i32_0 : i32
    scf.if %2 {
      %cst_34 = arith.constant 0.000000e+00 : f32
      %43 = vector.broadcast %cst_34 : f32 to vector<2x1xf32>
      %c0_35 = arith.constant 0 : index
      %c0_36 = arith.constant 0 : index
      %44 = vector.load %arg4[%c0_35, %c0_36] : memref<2x1xf32, #tpu.memory_space<vmem>>, vector<2x1xf32>
      tpu.vector_store %arg4[%c0_35, %c0_36], %43 {strides = array<i32>} : memref<2x1xf32, #tpu.memory_space<vmem>>, vector<2x1xf32>,
      %cst_37 = arith.constant 0.000000e+00 : f32
      %45 = vector.broadcast %cst_37 : f32 to vector<2x1xf32>
      %c0_38 = arith.constant 0 : index
      %c0_39 = arith.constant 0 : index
      %46 = vector.load %arg5[%c0_38, %c0_39] : memref<2x1xf32, #tpu.memory_space<vmem>>, vector<2x1xf32>
      tpu.vector_store %arg5[%c0_38, %c0_39], %45 {strides = array<i32>} : memref<2x1xf32, #tpu.memory_space<vmem>>, vector<2x1xf32>,
      %cst_40 = arith.constant 0.000000e+00 : f32
      %47 = vector.broadcast %cst_40 : f32 to vector<2x1xf32>
      %c0_41 = arith.constant 0 : index
      %c0_42 = arith.constant 0 : index
      %48 = vector.load %arg6[%c0_41, %c0_42] : memref<2x1xf32, #tpu.memory_space<vmem>>, vector<2x1xf32>
      tpu.vector_store %arg6[%c0_41, %c0_42], %47 {strides = array<i32>} : memref<2x1xf32, #tpu.memory_space<vmem>>, vector<2x1xf32>,
      %cst_43 = arith.constant 0.000000e+00 : f32
      %49 = vector.broadcast %cst_43 : f32 to vector<2x1xf32>
      %c0_44 = arith.constant 0 : index
      %c0_45 = arith.constant 0 : index
      %50 = vector.load %arg7[%c0_44, %c0_45] : memref<2x1xf32, #tpu.memory_space<vmem>>, vector<2x1xf32>
      tpu.vector_store %arg7[%c0_44, %c0_45], %49 {strides = array<i32>} : memref<2x1xf32, #tpu.memory_space<vmem>>, vector<2x1xf32>,
      %cst_46 = arith.constant 0.000000e+00 : f32
      %51 = vector.broadcast %cst_46 : f32 to vector<2x1xf32>
      %c0_47 = arith.constant 0 : index
      %c0_48 = arith.constant 0 : index
      %52 = vector.load %arg8[%c0_47, %c0_48] : memref<2x1xf32, #tpu.memory_space<vmem>>, vector<2x1xf32>
      tpu.vector_store %arg8[%c0_47, %c0_48], %51 {strides = array<i32>} : memref<2x1xf32, #tpu.memory_space<vmem>>, vector<2x1xf32>,
      %cst_49 = arith.constant 0.000000e+00 : f32
      %53 = vector.broadcast %cst_49 : f32 to vector<2x1xf32>
      %c0_50 = arith.constant 0 : index
      %c0_51 = arith.constant 0 : index
      %54 = vector.load %arg9[%c0_50, %c0_51] : memref<2x1xf32, #tpu.memory_space<vmem>>, vector<2x1xf32>
      tpu.vector_store %arg9[%c0_50, %c0_51], %53 {strides = array<i32>} : memref<2x1xf32, #tpu.memory_space<vmem>>, vector<2x1xf32>,
    } else {
    }
    %c0 = arith.constant 0 : index
    %c0_1 = arith.constant 0 : index
    %3 = vector.load %arg1[%c0, %c0_1] : memref<2x512xf32, #tpu.memory_space<vmem>>, vector<2x512xf32>
    %c0_2 = arith.constant 0 : index
    %c0_3 = arith.constant 0 : index
    %4 = vector.load %arg2[%c0_2, %c0_3] : memref<2x512xf32, #tpu.memory_space<vmem>>, vector<2x512xf32>
    %5 = arith.subf %3, %4 : vector<2x512xf32>
    %c0_4 = arith.constant 0 : index
    %c0_5 = arith.constant 0 : index
    %6 = vector.load %arg9[%c0_4, %c0_5] : memref<2x1xf32, #tpu.memory_space<vmem>>, vector<2x1xf32>
    %7 = arith.mulf %5, %5 : vector<2x512xf32>
    %cst = arith.constant dense<0.000000e+00> : vector<2xf32>
    %8 = vector.multi_reduction <add>, %7, %cst [1] : vector<2x512xf32> to vector<2xf32>
    %9 = vector.shape_cast %8 : vector<2xf32> to vector<2x1xf32>
    %10 = arith.addf %6, %9 : vector<2x1xf32>
    %c0_6 = arith.constant 0 : index
    %c0_7 = arith.constant 0 : index
    %11 = vector.load %arg9[%c0_6, %c0_7] : memref<2x1xf32, #tpu.memory_space<vmem>>, vector<2x1xf32>
    tpu.vector_store %arg9[%c0_6, %c0_7], %10 {strides = array<i32>} : memref<2x1xf32, #tpu.memory_space<vmem>>, vector<2x1xf32>,
    %c0_8 = arith.constant 0 : index
    %c0_9 = arith.constant 0 : index
    %12 = vector.load %arg4[%c0_8, %c0_9] : memref<2x1xf32, #tpu.memory_space<vmem>>, vector<2x1xf32>
    %cst_10 = arith.constant dense<0.000000e+00> : vector<2xf32>
    %13 = vector.multi_reduction <add>, %3, %cst_10 [1] : vector<2x512xf32> to vector<2xf32>
    %14 = vector.shape_cast %13 : vector<2xf32> to vector<2x1xf32>
    %15 = arith.addf %12, %14 : vector<2x1xf32>
    %c0_11 = arith.constant 0 : index
    %c0_12 = arith.constant 0 : index
    %16 = vector.load %arg4[%c0_11, %c0_12] : memref<2x1xf32, #tpu.memory_space<vmem>>, vector<2x1xf32>
    tpu.vector_store %arg4[%c0_11, %c0_12], %15 {strides = array<i32>} : memref<2x1xf32, #tpu.memory_space<vmem>>, vector<2x1xf32>,
    %c0_13 = arith.constant 0 : index
    %c0_14 = arith.constant 0 : index
    %17 = vector.load %arg5[%c0_13, %c0_14] : memref<2x1xf32, #tpu.memory_space<vmem>>, vector<2x1xf32>
    %cst_15 = arith.constant dense<0.000000e+00> : vector<2xf32>
    %18 = vector.multi_reduction <add>, %4, %cst_15 [1] : vector<2x512xf32> to vector<2xf32>
    %19 = vector.shape_cast %18 : vector<2xf32> to vector<2x1xf32>
    %20 = arith.addf %17, %19 : vector<2x1xf32>
    %c0_16 = arith.constant 0 : index
    %c0_17 = arith.constant 0 : index
    %21 = vector.load %arg5[%c0_16, %c0_17] : memref<2x1xf32, #tpu.memory_space<vmem>>, vector<2x1xf32>
    tpu.vector_store %arg5[%c0_16, %c0_17], %20 {strides = array<i32>} : memref<2x1xf32, #tpu.memory_space<vmem>>, vector<2x1xf32>,
    %c0_18 = arith.constant 0 : index
    %c0_19 = arith.constant 0 : index
    %22 = vector.load %arg6[%c0_18, %c0_19] : memref<2x1xf32, #tpu.memory_space<vmem>>, vector<2x1xf32>
    %23 = arith.mulf %3, %3 : vector<2x512xf32>
    %cst_20 = arith.constant dense<0.000000e+00> : vector<2xf32>
    %24 = vector.multi_reduction <add>, %23, %cst_20 [1] : vector<2x512xf32> to vector<2xf32>
    %25 = vector.shape_cast %24 : vector<2xf32> to vector<2x1xf32>
    %26 = arith.addf %22, %25 : vector<2x1xf32>
    %c0_21 = arith.constant 0 : index
    %c0_22 = arith.constant 0 : index
    %27 = vector.load %arg6[%c0_21, %c0_22] : memref<2x1xf32, #tpu.memory_space<vmem>>, vector<2x1xf32>
    tpu.vector_store %arg6[%c0_21, %c0_22], %26 {strides = array<i32>} : memref<2x1xf32, #tpu.memory_space<vmem>>, vector<2x1xf32>,
    %c0_23 = arith.constant 0 : index
    %c0_24 = arith.constant 0 : index
    %28 = vector.load %arg7[%c0_23, %c0_24] : memref<2x1xf32, #tpu.memory_space<vmem>>, vector<2x1xf32>
    %29 = arith.mulf %4, %4 : vector<2x512xf32>
    %cst_25 = arith.constant dense<0.000000e+00> : vector<2xf32>
    %30 = vector.multi_reduction <add>, %29, %cst_25 [1] : vector<2x512xf32> to vector<2xf32>
    %31 = vector.shape_cast %30 : vector<2xf32> to vector<2x1xf32>
    %32 = arith.addf %28, %31 : vector<2x1xf32>
    %c0_26 = arith.constant 0 : index
    %c0_27 = arith.constant 0 : index
    %33 = vector.load %arg7[%c0_26, %c0_27] : memref<2x1xf32, #tpu.memory_space<vmem>>, vector<2x1xf32>
    tpu.vector_store %arg7[%c0_26, %c0_27], %32 {strides = array<i32>} : memref<2x1xf32, #tpu.memory_space<vmem>>, vector<2x1xf32>,
    %c0_28 = arith.constant 0 : index
    %c0_29 = arith.constant 0 : index
    %34 = vector.load %arg8[%c0_28, %c0_29] : memref<2x1xf32, #tpu.memory_space<vmem>>, vector<2x1xf32>
    %35 = arith.mulf %3, %4 : vector<2x512xf32>
    %cst_30 = arith.constant dense<0.000000e+00> : vector<2xf32>
    %36 = vector.multi_reduction <add>, %35, %cst_30 [1] : vector<2x512xf32> to vector<2xf32>
    %37 = vector.shape_cast %36 : vector<2xf32> to vector<2x1xf32>
    %38 = arith.addf %34, %37 : vector<2x1xf32>
    %c0_31 = arith.constant 0 : index
    %c0_32 = arith.constant 0 : index
    %39 = vector.load %arg8[%c0_31, %c0_32] : memref<2x1xf32, #tpu.memory_space<vmem>>, vector<2x1xf32>
    tpu.vector_store %arg8[%c0_31, %c0_32], %38 {strides = array<i32>} : memref<2x1xf32, #tpu.memory_space<vmem>>, vector<2x1xf32>,
    %c3_i32 = arith.constant 3 : i32
    %40 = arith.cmpi eq, %arg0, %c3_i32 : i32
    %41 = arith.extui %40 : i1 to i32
    %c0_i32_33 = arith.constant 0 : i32
    %42 = arith.cmpi ne, %41, %c0_i32_33 : i32
    scf.if %42 {
      %c0_34 = arith.constant 0 : index
      %c0_35 = arith.constant 0 : index
      %43 = vector.load %arg9[%c0_34, %c0_35] : memref<2x1xf32, #tpu.memory_space<vmem>>, vector<2x1xf32>
      %44 = vector.shape_cast %43 : vector<2x1xf32> to vector<1x2x1xf32>
      %cst_36 = arith.constant dense<0.000000e+00> : vector<1xf32>
      %45 = vector.multi_reduction <add>, %44, %cst_36 [1, 2] : vector<1x2x1xf32> to vector<1xf32>
      %46 = vector.shape_cast %45 : vector<1xf32> to vector<1x1x1xf32>
      %47 = vector.extract %46[0, 0, 0] : f32 from vector<1x1x1xf32>
      %cst_37 = arith.constant 2.44140625E-4 : f32
      %48 = arith.mulf %47, %cst_37 : f32
      %cst_38 = arith.constant 1.000000e+00 : f32
      %49 = arith.mulf %cst_38, %48 : f32
      %cst_39 = arith.constant 0.000000e+00 : f32
      %50 = arith.addf %cst_39, %49 : f32
      %c0_40 = arith.constant 0 : index
      %c0_41 = arith.constant 0 : index
      %51 = vector.load %arg4[%c0_40, %c0_41] : memref<2x1xf32, #tpu.memory_space<vmem>>, vector<2x1xf32>
      %c0_42 = arith.constant 0 : index
      %c0_43 = arith.constant 0 : index
      %52 = vector.load %arg5[%c0_42, %c0_43] : memref<2x1xf32, #tpu.memory_space<vmem>>, vector<2x1xf32>
      %c0_44 = arith.constant 0 : index
      %c0_45 = arith.constant 0 : index
      %53 = vector.load %arg6[%c0_44, %c0_45] : memref<2x1xf32, #tpu.memory_space<vmem>>, vector<2x1xf32>
      %c0_46 = arith.constant 0 : index
      %c0_47 = arith.constant 0 : index
      %54 = vector.load %arg7[%c0_46, %c0_47] : memref<2x1xf32, #tpu.memory_space<vmem>>, vector<2x1xf32>
      %c0_48 = arith.constant 0 : index
      %c0_49 = arith.constant 0 : index
      %55 = vector.load %arg8[%c0_48, %c0_49] : memref<2x1xf32, #tpu.memory_space<vmem>>, vector<2x1xf32>
      %cst_50 = arith.constant 4.8828125E-4 : f32
      %56 = vector.broadcast %cst_50 : f32 to vector<2x1xf32>
      %57 = arith.mulf %51, %56 : vector<2x1xf32>
      %cst_51 = arith.constant 4.8828125E-4 : f32
      %58 = vector.broadcast %cst_51 : f32 to vector<2x1xf32>
      %59 = arith.mulf %52, %58 : vector<2x1xf32>
      %cst_52 = arith.constant 4.8828125E-4 : f32
      %60 = vector.broadcast %cst_52 : f32 to vector<2x1xf32>
      %61 = arith.mulf %53, %60 : vector<2x1xf32>
      %62 = arith.mulf %57, %57 : vector<2x1xf32>
      %63 = arith.subf %61, %62 : vector<2x1xf32>
      %cst_53 = arith.constant 4.8828125E-4 : f32
      %64 = vector.broadcast %cst_53 : f32 to vector<2x1xf32>
      %65 = arith.mulf %54, %64 : vector<2x1xf32>
      %66 = arith.mulf %59, %59 : vector<2x1xf32>
      %67 = arith.subf %65, %66 : vector<2x1xf32>
      %cst_54 = arith.constant 4.8828125E-4 : f32
      %68 = vector.broadcast %cst_54 : f32 to vector<2x1xf32>
      %69 = arith.mulf %55, %68 : vector<2x1xf32>
      %70 = arith.mulf %57, %59 : vector<2x1xf32>
      %71 = arith.subf %69, %70 : vector<2x1xf32>
      %cst_55 = arith.constant 2.000000e+00 : f32
      %72 = vector.broadcast %cst_55 : f32 to vector<2x1xf32>
      %73 = arith.mulf %72, %71 : vector<2x1xf32>
      %74 = arith.addf %63, %67 : vector<2x1xf32>
      %75 = arith.subf %57, %59 : vector<2x1xf32>
      %76 = arith.mulf %75, %75 : vector<2x1xf32>
      %77 = arith.addf %74, %76 : vector<2x1xf32>
      %78 = arith.divf %73, %77 : vector<2x1xf32>
      %cst_56 = arith.constant 1.000000e+00 : f32
      %79 = vector.broadcast %cst_56 : f32 to vector<2x1xf32>
      %80 = arith.subf %79, %78 : vector<2x1xf32>
      %81 = vector.extract_strided_slice %80 {offsets = [0, 0], sizes = [1, 1], strides = [1, 1]} : vector<2x1xf32> to vector<1x1xf32>
      %82 = vector.extract %81[0, 0] : f32 from vector<1x1xf32>
      %83 = vector.extract_strided_slice %80 {offsets = [1, 0], sizes = [1, 1], strides = [1, 1]} : vector<2x1xf32> to vector<1x1xf32>
      %84 = vector.extract %83[0, 0] : f32 from vector<1x1xf32>
      %85 = arith.addf %82, %84 : f32
      %cst_57 = arith.constant 5.000000e-01 : f32
      %86 = arith.mulf %85, %cst_57 : f32
      %87 = arith.addf %50, %86 : f32
      %88 = vector.broadcast %87 : f32 to vector<1x128xf32>
      %c0_58 = arith.constant 0 : index
      %c0_59 = arith.constant 0 : index
      %89 = vector.load %arg3[%c0_58, %c0_59] : memref<1x128xf32, #tpu.memory_space<vmem>>, vector<1x128xf32>
      tpu.vector_store %arg3[%c0_58, %c0_59], %88 {strides = array<i32>} : memref<1x128xf32, #tpu.memory_space<vmem>>, vector<1x128xf32>,
    } else {
    }
    return
  }
  func.func @transform_0(%arg0: i32) -> (i32, i32) {
    %c0_i32 = arith.constant 0 : i32
    %c0_i32_0 = arith.constant 0 : i32
    return %c0_i32, %arg0 : i32, i32
  }
  func.func @transform_1(%arg0: i32) -> (i32, i32) {
    %c0_i32 = arith.constant 0 : i32
    %c0_i32_0 = arith.constant 0 : i32
    return %c0_i32, %arg0 : i32, i32
  }
  func.func @transform_2(%arg0: i32) -> (i32, i32) {
    %c0_i32 = arith.constant 0 : i32
    %c0_i32_0 = arith.constant 0 : i32
    %c0_i32_1 = arith.constant 0 : i32
    return %c0_i32, %c0_i32_0 : i32, i32
  }
}

</mosaic_0001>

<bundles_post_ra>
// kernel: tpu_custom_call.1
= control target key start
LH: loop header
LB: loop body
LE: loop exit
PB: predicated region body
PF: predicated region fallthrough
CT: control target
= control target key end

     0   :  { %7 = vsyncpa [#allocation9], 0  ;;  %s875_s0 = inlined_call_operand.hbm [shape: f32[2,2048], index: 0, kind: input, shape index: {}]   ;;  %s876_s1 = inlined_call_operand.hbm [shape: f32[2,2048], index: 1, kind: input, shape index: {}]   ;;  %s877_s2 = inlined_call_operand.hbm [shape: f32[1,128], index: 2, kind: output, shape index: {}]  }
   0x1   :  { %9 = vsyncpa [#allocation9 + $0x1], 0 }
   0x2   :  { %10 = vsyncpa [#allocation12], 0 }
   0x3   :  { %12 = vsyncpa [#allocation12 + $0x1], 0 }
   0x4   :  { %13 = vsyncpa [#allocation10], 0  ;;  %s717_s9 = smov 0   ;;  %s719_s10 = smov 0  }
   0x5   :  { %s721_s11 = smov 0   ;;  %s723_s12 = smov 0  }
   0x6 LB: > { %s736_s13 = sadd.s32 4294967295, %s698_s12   ;;  %s739_s14 = sadd.s32 1, %s698_s12   ;;  %s698_s12 = sphi %s723_s12, %s885_s12   ;;  %s694_s11 = sphi %s721_s11, %s884_s11   ;;  %s690_s10 = sphi %s719_s10, %s883_s10   ;;  %s686_s9 = sphi %s717_s9, %s882_s9  }
   0x7   : > { %s23_s15 = ssub.s32 %s698_s12, %s739_s14  ;;  %s26_s16 = sadd.s32 1, %s694_s11 }
   0x8   : > { %p24_p0 = scmp.eq.s32.totalorder %s23_s15, 0  ;;  %p33_p1 = scmp.ne.s32.totalorder %s694_s11, %s690_s10 }
   0x9   : > { %p34_p2 = scmp.eq.s32.totalorder %s698_s12, 0  ;;  %p39_p3 = scmp.ne.s32.totalorder %s690_s10, %s686_s9 }
   0xa   : > { %s749_s17 = scalar_select %p24_p0, %s694_s11, %s26_s16  }
   0xb   : > { %p751_p4 = por %p34_p2, %p33_p1  ;;  %p40_p5 = scmp.eq.s32.totalorder %s736_s13, 0 }
   0xc   : > { %p529_p6 = scmp.lt.s32.totalorder %s698_s12, 4  ;;  %s762_s20 = sand.u32 1, %s694_s11  }
   0xd   : > { %p757_p7 = por %p40_p5, %p39_p3  ;;  %s491_s21 = sshll.u32 %s762_s20, 3 }
   0xe   : > { %s506_s22 = sshll.u32 %s698_s12, 3  ;;  %s114_s26 = scalar_lea.vmem [#allocation8], %s491_s21 }
   0xf   : > { %s119_s25 = scalar_lea.hbm %s875_s0, %s506_s22  ;;  %s123_s27 = sshll.u32 %s114_s26, 4  ;;  %s124_s27 = int_to_ptr.vmem [resolvable:$true] %s123_s27 }
  0x10   : > { %s121_s28 = sshll.u32 %s119_s25, 4  ;;  %p771_p8 = pnand %p529_p6, %p751_p4  ;;  %s122_s28 = int_to_ptr.hbm [resolvable:$true] %s121_s28 }
  0x11   : > { %p497_p9 = scmp.ge.s32.totalorder %s698_s12, 1  ;;  %p148_p10 = scmp.lt.s32.totalorder %s698_s12, 5 }
  0x12   : > { %s111_s30 = scalar_lea.sflag [#allocation9], %s762_s20  ;;  %s568_s3 = sshra.s32 %s122_s28, 4  ;;  %s569_s3 = int_to_ptr.hbm [resolvable:$true] %s568_s3 }
  0x13   : > { %s570_s4 = scalar_lea.hbm %s569_s3, 8  ;;  %p572_p12 = pneg %p771_p8 }
  0x14   : > { %p571_p11 = scmp.ne.s32.totalorder %s569_s3, %s570_s4  ;;  %s575_s7 = scalar_lea.hbm %s875_s0, 32 }
  0x15   : > { %p576_p1 = scmp.lt.s32.totalorder %s569_s3, %s875_s0  ;;  %p577_p2 = scmp.lt.s32.totalorder %s575_s7, %s570_s4 }
  0x16   : > { %p573_p13 = pnand %p572_p12, %p571_p11 }
  0x17   : > { %p578_p3 = por %p577_p2, %p576_p1 }
  0x18   : > { %p574_p0 = pneg %p573_p13 }
  0x1a   : > { %p579_p4 = pnand %p578_p3, %p574_p0 }
  0x1c   : > { %582 = shalt.err (!%p579_p4)
}
  0x1d   : > { %525 = dma.hbm_to_vmem [thread:$0]  (!%p771_p8), %s122_s28, 128, %s124_s27, %s111_s30  }
  0x1e   : > { %p795_p5 = pnand %p497_p9, %p148_p10  ;;  %s139_s23 = scalar_lea.hbm %s876_s1, %s506_s22 }
  0x1f   : > { %s134_s24 = scalar_lea.vmem [#allocation11], %s491_s21  ;;  %s141_s26 = sshll.u32 %s139_s23, 4  ;;  %s142_s26 = int_to_ptr.hbm [resolvable:$true] %s141_s26 }
  0x20   : > { %s143_s25 = sshll.u32 %s134_s24, 4  ;;  %s131_s3 = scalar_lea.sflag [#allocation12], %s762_s20  ;;  %s144_s25 = int_to_ptr.vmem [resolvable:$true] %s143_s25 }
  0x21   : > { %s598_s4 = sshra.s32 %s142_s26, 4  ;;  %s605_s28 = scalar_lea.hbm %s876_s1, 32  ;;  %s599_s4 = int_to_ptr.hbm [resolvable:$true] %s598_s4 }
  0x22   : > { %s600_s5 = scalar_lea.hbm %s599_s4, 8  ;;  %p606_p11 = scmp.lt.s32.totalorder %s599_s4, %s876_s1 }
  0x23   : > { %p601_p6 = scmp.ne.s32.totalorder %s599_s4, %s600_s5  ;;  %p607_p13 = scmp.lt.s32.totalorder %s605_s28, %s600_s5 }
  0x25   : > { %p603_p9 = pnand %p601_p6, %p572_p12  ;;  %p608_p0 = por %p607_p13, %p606_p11 }
  0x27   : > { %p604_p10 = pneg %p603_p9 }
  0x29   : > { %p609_p1 = pnand %p608_p0, %p604_p10 }
  0x2b   : > { %612 = shalt.err (!%p609_p1)
}
  0x2c   : > { %528 = dma.hbm_to_vmem [thread:$0]  (!%p771_p8), %s142_s26, 128, %s144_s25, %s131_s3  }
  0x2d   : > { %152 = sbr.rel (%p795_p5) target bundleno = 447 (0x1bf), region = 28  ;;  %s154_s20 = sand.u32 (!%p795_p5), 1, %s690_s10  }
  0x2e   : > { %s498_s21 = sshll.u32 (!%p795_p5), %s154_s20, 3  ;;  %s155_s6 = scalar_lea.sflag (!%p795_p5), [#allocation9], %s154_s20 }
  0x2f   : > { %s158_s7 = scalar_lea.vmem (!%p795_p5), [#allocation8], %s498_s21 }
  0x32   : > { %673 = dma.done.wait (%p757_p7), %s155_s6, 128  }
  0x33   : > { %675 = vsyncadd (%p757_p7), %s155_s6, 4294967168  ;;  %s165_s8 = scalar_lea.sflag [#allocation12], %s154_s20  ;;  %s168_s9 = scalar_lea.vmem [#allocation11], %s498_s21 }
  0x34   : > { %677 = dma.done.wait (%p757_p7), %s165_s8, 128  }
  0x35   : > { %679 = vsyncadd (%p757_p7), %s165_s8, 4294967168  ;;  %p500_p8 = scmp.ne.s32.totalorder %s736_s13, 0 }
  0x37   : > { %195 = sbr.rel (%p500_p8) target bundleno = 67 (0x43), region = 40 }
  0x3c   : > { %vm196_vm0 = vcmask 1024   ;;  %v700_v0 = vmov 0.0  }
  0x3d   : > { %197 = vst.msk [vmem:[#allocation2] sm:$0x3] %vm196_vm0, %v700_v0 }
  0x3e   : > { %198 = vst.msk [vmem:[#allocation3] sm:$0x3] %vm196_vm0, %v700_v0 }
  0x3f   : > { %199 = vst.msk [vmem:[#allocation4] sm:$0x3] %vm196_vm0, %v700_v0 }
  0x40   : > { %200 = vst.msk [vmem:[#allocation5] sm:$0x3] %vm196_vm0, %v700_v0 }
  0x41   : > { %201 = vst.msk [vmem:[#allocation6] sm:$0x3] %vm196_vm0, %v700_v0 }
  0x42   : > { %202 = vst.msk [vmem:[#allocation7] sm:$0x3] %vm196_vm0, %v700_v0 }
  0x43 PF: > { %v203_v1 = vld [vmem:[%s158_s7] sm:$0xff]  ;;  %v204_v2 = vld [vmem:[%s168_s9] sm:$0xff]  ;;  %vm218_vm1 = vcmask 1041408   ;;  %vm229_vm2 = vcmask 1024   ;;  %p501_p7 = scmp.ne.s32.totalorder %s736_s13, 3 }
  0x44   : > { %v205_v3 = vsub.f32 %v203_v1, %v204_v2  ;;  %v276_v22 = vmul.f32 %v203_v1, %v203_v1  ;;  %v299_v38 = vmul.f32 %v204_v2, %v204_v2  ;;  %v322_v50 = vmul.f32 %v204_v2, %v203_v1 }
  0x46   : > { %v207_v4 = vmul.f32 %v205_v3, %v205_v3 }
  0x48   : > { %209 = vst [vmem:[#allocation1] ss:$4 sm:$0xff] %v207_v4 }
  0x4f   : > { %v210_v5 = vld.sshfl [vmem:[#allocation1] sm:$0xff pattern:$0x73625140]  ;;  %v211_v6 = vld.sshfl [vmem:[#allocation1 + $0x8] sm:$0xff pattern:$0x73625140] }
  0x50   : > { %v212_v7 = vld.sshfl [vmem:[#allocation1 + $0x10] sm:$0xff pattern:$0x73625140]  ;;  %v213_v8 = vld.sshfl [vmem:[#allocation1 + $0x18] sm:$0xff pattern:$0x73625140] }
  0x51   : > { %233 = vst [vmem:[#allocation1] ss:$4 sm:$0xff] %v203_v1  ;;  %v219_v9 = vsel %vm218_vm1, %v210_v5, 0.0  ;;  %v220_v10 = vsel %vm218_vm1, %v211_v6, 0.0  ;;  %v222_v12 = vsel %vm218_vm1, %v212_v7, 0.0  ;;  %v224_v18 = vsel %vm218_vm1, %v213_v8, 0.0 }
  0x52   : > { %v221_v11 = vadd.f32 %v220_v10, %v219_v9  ;;  %v206_v10 = vld [vmem:[#allocation7] sm:$0x3] }
  0x54   : > { %v223_v15 = vadd.f32 %v222_v12, %v221_v11 }
  0x56   : > { %v225_v19 = vadd.f32 %v224_v18, %v223_v15  ;;  %v253_v15 = vld [vmem:[#allocation3] sm:$0x3] }
  0x58   : > { %v234_v13 = vld.sshfl [vmem:[#allocation1] sm:$0xff pattern:$0x73625140]  ;;  %v235_v14 = vld.sshfl [vmem:[#allocation1 + $0x8] sm:$0xff pattern:$0x73625140]  ;;  %226 = vadd.xlane.f32.xlu0 %v225_v19 }
  0x59   : > { %v236_v16 = vld.sshfl [vmem:[#allocation1 + $0x10] sm:$0xff pattern:$0x73625140]  ;;  %v237_v17 = vld.sshfl [vmem:[#allocation1 + $0x18] sm:$0xff pattern:$0x73625140] }
  0x5a   : > { %255 = vst [vmem:[#allocation1] ss:$4 sm:$0xff] %v204_v2  ;;  %v242_v20 = vsel %vm218_vm1, %v234_v13, 0.0  ;;  %v243_v21 = vsel %vm218_vm1, %v235_v14, 0.0  ;;  %v245_v24 = vsel %vm218_vm1, %v236_v16, 0.0  ;;  %v247_v34 = vsel %vm218_vm1, %v237_v17, 0.0 }
  0x5b   : > { %v244_v23 = vadd.f32 %v243_v21, %v242_v20  ;;  %v231_v13 = vld [vmem:[#allocation2] sm:$0x3]  ;;  %v275_v19 = vld [vmem:[#allocation4] sm:$0x3] }
  0x5d   : > { %v246_v27 = vadd.f32 %v245_v24, %v244_v23 }
  0x5f   : > { %v248_v36 = vadd.f32 %v247_v34, %v246_v27 }
  0x61   : > { %v256_v25 = vld.sshfl [vmem:[#allocation1] sm:$0xff pattern:$0x73625140]  ;;  %v257_v26 = vld.sshfl [vmem:[#allocation1 + $0x8] sm:$0xff pattern:$0x73625140]  ;;  %249 = vadd.xlane.f32.xlu0 %v248_v36 }
  0x62   : > { %v258_v28 = vld.sshfl [vmem:[#allocation1 + $0x10] sm:$0xff pattern:$0x73625140]  ;;  %v259_v29 = vld.sshfl [vmem:[#allocation1 + $0x18] sm:$0xff pattern:$0x73625140] }
  0x63   : > { %278 = vst [vmem:[#allocation1] ss:$4 sm:$0xff] %v276_v22  ;;  %v264_v30 = vsel %vm218_vm1, %v256_v25, 0.0  ;;  %v265_v31 = vsel %vm218_vm1, %v257_v26, 0.0  ;;  %v267_v32 = vsel %vm218_vm1, %v258_v28, 0.0  ;;  %v269_v35 = vsel %vm218_vm1, %v259_v29, 0.0 }
  0x64   : > { %v266_v33 = vadd.f32 %v265_v31, %v264_v30  ;;  %v298_v22 = vld [vmem:[#allocation5] sm:$0x3]  ;;  %v321_v25 = vld [vmem:[#allocation6] sm:$0x3] }
  0x66   : > { %v268_v37 = vadd.f32 %v267_v32, %v266_v33 }
  0x68   : > { %v270_v39 = vadd.f32 %v269_v35, %v268_v37 }
  0x6a   : > { %v279_v40 = vld.sshfl [vmem:[#allocation1] sm:$0xff pattern:$0x73625140]  ;;  %v280_v41 = vld.sshfl [vmem:[#allocation1 + $0x8] sm:$0xff pattern:$0x73625140]  ;;  %271 = vadd.xlane.f32.xlu1 %v270_v39 }
  0x6b   : > { %v281_v42 = vld.sshfl [vmem:[#allocation1 + $0x10] sm:$0xff pattern:$0x73625140]  ;;  %v282_v43 = vld.sshfl [vmem:[#allocation1 + $0x18] sm:$0xff pattern:$0x73625140] }
  0x6c   : > { %301 = vst [vmem:[#allocation1] ss:$4 sm:$0xff] %v299_v38  ;;  %v287_v44 = vsel %vm218_vm1, %v279_v40, 0.0  ;;  %v288_v45 = vsel %vm218_vm1, %v280_v41, 0.0  ;;  %v290_v46 = vsel %vm218_vm1, %v281_v42, 0.0  ;;  %v292_v48 = vsel %vm218_vm1, %v282_v43, 0.0 }
  0x6d   : > { %v289_v47 = vadd.f32 %v288_v45, %v287_v44 }
  0x6f   : > { %v291_v49 = vadd.f32 %v290_v46, %v289_v47 }
  0x71   : > { %v293_v51 = vadd.f32 %v292_v48, %v291_v49 }
  0x73   : > { %v302_v52 = vld.sshfl [vmem:[#allocation1] sm:$0xff pattern:$0x73625140]  ;;  %v303_v53 = vld.sshfl [vmem:[#allocation1 + $0x8] sm:$0xff pattern:$0x73625140]  ;;  %294 = vadd.xlane.f32.xlu1 %v293_v51 }
  0x74   : > { %v304_v54 = vld.sshfl [vmem:[#allocation1 + $0x10] sm:$0xff pattern:$0x73625140]  ;;  %v305_v55 = vld.sshfl [vmem:[#allocation1 + $0x18] sm:$0xff pattern:$0x73625140] }
  0x75   : > { %v310_v56 = vsel %vm218_vm1, %v302_v52, 0.0  ;;  %v311_v57 = vsel %vm218_vm1, %v303_v53, 0.0  ;;  %v313_v58 = vsel %vm218_vm1, %v304_v54, 0.0  ;;  %324 = vst [vmem:[#allocation1] ss:$4 sm:$0xff] %v322_v50  ;;  %v315_v60 = vsel %vm218_vm1, %v305_v55, 0.0 }
  0x76   : > { %v312_v59 = vadd.f32 %v311_v57, %v310_v56 }
  0x78   : > { %v314_v61 = vadd.f32 %v313_v58, %v312_v59 }
  0x7a   : > { %v316_v62 = vadd.f32 %v315_v60, %v314_v61 }
  0x7c   : > { %317 = vadd.xlane.f32.xlu2 %v316_v62  ;;  %v325_v63 = vld.sshfl [vmem:[#allocation1] sm:$0xff pattern:$0x73625140]  ;;  %v326_v0 = vld.sshfl [vmem:[#allocation1 + $0x8] sm:$0xff pattern:$0x73625140] }
  0x7d   : > { %v327_v1 = vld.sshfl [vmem:[#allocation1 + $0x10] sm:$0xff pattern:$0x73625140]  ;;  %v328_v2 = vld.sshfl [vmem:[#allocation1 + $0x18] sm:$0xff pattern:$0x73625140] }
  0x7e   : > { %v333_v3 = vsel %vm218_vm1, %v325_v63, 0.0  ;;  %v334_v4 = vsel %vm218_vm1, %v326_v0, 0.0  ;;  %v336_v5 = vsel %vm218_vm1, %v327_v1, 0.0  ;;  %v338_v7 = vsel %vm218_vm1, %v328_v2, 0.0 }
  0x7f   : > { %v335_v6 = vadd.f32 %v334_v4, %v333_v3 }
  0x81   : > { %v337_v8 = vadd.f32 %v336_v5, %v335_v6 }
  0x83   : > { %v339_v9 = vadd.f32 %v338_v7, %v337_v8 }
  0x85   : > { %340 = vadd.xlane.f32.xlu2 %v339_v9 }
  0xcb   : > { %v227_v11 = vpop.xlane.xlu0 %226 }
  0xcc   : > { %v228_v12 = vadd.f32 %v227_v11, %v206_v10 }
  0xce   : > { %230 = vst.msk [vmem:[#allocation7] sm:$0x3] %vm229_vm2, %v228_v12 }
  0xd4   : > { %v250_v14 = vpop.xlane.xlu0 %249 }
  0xd5   : > { %v251_v16 = vadd.f32 %v250_v14, %v231_v13 }
  0xd7   : > { %252 = vst.msk [vmem:[#allocation2] sm:$0x3] %vm229_vm2, %v251_v16 }
  0xdd   : > { %v272_v17 = vpop.xlane.xlu1 %271 }
  0xde   : > { %v273_v18 = vadd.f32 %v272_v17, %v253_v15 }
  0xe0   : > { %274 = vst.msk [vmem:[#allocation3] sm:$0x3] %vm229_vm2, %v273_v18 }
  0xe6   : > { %v295_v20 = vpop.xlane.xlu1 %294 }
  0xe7   : > { %v296_v21 = vadd.f32 %v295_v20, %v275_v19 }
  0xe9   : > { %297 = vst.msk [vmem:[#allocation4] sm:$0x3] %vm229_vm2, %v296_v21 }
  0xef   : > { %v318_v23 = vpop.xlane.xlu2 %317 }
  0xf0   : > { %v319_v24 = vadd.f32 %v318_v23, %v298_v22 }
  0xf2   : > { %320 = vst.msk [vmem:[#allocation5] sm:$0x3] %vm229_vm2, %v319_v24 }
  0xf7   : > { %347 = sbr.rel (%p501_p7) target bundleno = 442 (0x1ba), region = 44 }
  0xf8   : > { %v341_v26 = vpop.xlane.xlu2 %340 }
  0xf9   : > { %v342_v27 = vadd.f32 %v341_v26, %v321_v25 }
  0xfb   : > { %343 = vst.msk [vmem:[#allocation6] sm:$0x3] %vm229_vm2, %v342_v27 }
  0xfc   : > { %v348_v28 = vld [vmem:[#allocation7] sm:$0x3]  ;;  %v361_v30 = vld [vmem:[#allocation2] sm:$0x3]  ;;  %v362_v31 = vld [vmem:[#allocation3] sm:$0x3] }
  0xfd   : > { %v349_v29 = vsel %vm229_vm2, %v348_v28, 0.0  ;;  %v366_v32 = vmul.f32 0.00048828125, %v361_v30  ;;  %v367_v33 = vmul.f32 0.00048828125, %v362_v31  ;;  %v363_v34 = vld [vmem:[#allocation4] sm:$0x3] }
  0xfe   : > { %350 = vadd.xlane.f32.xlu0 %v349_v29  ;;  %v364_v35 = vld [vmem:[#allocation5] sm:$0x3]  ;;  %v368_v36 = vmul.f32 0.00048828125, %v363_v34 }
  0xff   : > { %v369_v37 = vmul.f32 %v366_v32, %v366_v32  ;;  %v371_v38 = vmul.f32 0.00048828125, %v364_v35  ;;  %v372_v39 = vmul.f32 %v367_v33, %v367_v33  ;;  %v379_v42 = vsub.f32 %v366_v32, %v367_v33 }
 0x100   : > { %v375_v52 = vmul.f32 %v367_v33, %v366_v32 }
 0x101   : > { %v370_v40 = vsub.f32 %v368_v36, %v369_v37  ;;  %v373_v41 = vsub.f32 %v371_v38, %v372_v39  ;;  %v380_v44 = vmul.f32 %v379_v42, %v379_v42 }
 0x102   : > { %v365_v49 = vld [vmem:[#allocation6] sm:$0x3] }
 0x103   : > { %v378_v43 = vadd.f32 %v373_v41, %v370_v40  ;;  %v374_v51 = vmul.f32 0.00048828125, %v365_v49 }
 0x105   : > { %v381_v45 = vadd.f32 %v380_v44, %v378_v43  ;;  %v376_v56 = vsub.f32 %v374_v51, %v375_v52 }
 0x107   : > { %566 = vrcp.f32 %v381_v45  ;;  %vm387_vm3 = vweird.f32 %v381_v45  ;;  %v393_v53 = vand.u32 2147483648, %v381_v45  ;;  %v391_v55 = vand.u32 2147483647, %v381_v45 }
 0x108   : > { %v377_v59 = vmul.f32 2.0, %v376_v56 }
 0x109   : > { %v394_v57 = vor.u32 1.1754944e-38, %v393_v53  ;;  %vm392_vm6 = vcmp.eq.f32.partialorder %v391_v55, 8.507059e+37 }
 0x10d   : > { %v567_v46 = vpop.eup %566 }
 0x10e   : > { %v383_v47 = vmul.f32 %v567_v46, %v381_v45  ;;  %vm388_vm4 = vweird.f32 %v567_v46 }
 0x10f   : > { %vm389_vm5 = vmor %vm387_vm3, %vm388_vm4 }
 0x110   : > { %v384_v48 = vsub.f32 1.0, %v383_v47 }
 0x112   : > { %v385_v50 = vmul.f32 %v567_v46, %v384_v48 }
 0x114   : > { %v386_v54 = vadd.f32 %v567_v46, %v385_v50 }
 0x116   : > { %v390_v58 = vsel %vm389_vm5, %v567_v46, %v386_v54 }
 0x117   : > { %v395_v61 = vsel %vm392_vm6, %v394_v57, %v390_v58 }
 0x118   : > { %v396_v0 = vmul.f32 %v395_v61, %v377_v59 }
 0x11a   : > { %v397_v3 = vsub.f32 1.0, %v396_v0 }
 0x11c   : > { %v399_v6 = vrot.slane %v397_v3, 1 }
 0x171   : > { %v351_v60 = vpop.xlane.xlu0 %350 }
 0x172   : > { %v352_v62 = vrot.slane %v351_v60, 4 }
 0x174   : > { %v353_v63 = vadd.f32 %v352_v62, %v351_v60 }
 0x176   : > { %v354_v1 = vrot.slane %v353_v63, 2 }
 0x178   : > { %v355_v2 = vadd.f32 %v354_v1, %v353_v63 }
 0x17a   : > { %v356_v4 = vrot.slane %v355_v2, 1 }
 0x17c   : > { %v357_v5 = vadd.f32 %v356_v4, %v355_v2 }
 0x17e   : > { %508 = vpush %v357_v5 }
 0x17f   : > { %510 = vpush %v397_v3 }
 0x180   : > { %512 = vpush %v399_v6 }
 0x1af   : > { %s509_s19 = spop %508 }
 0x1b0   : > { %s511_s29 = spop %510  ;;  %s359_s18 = smul.f32 0.00024414063, %s509_s19 }
 0x1b1   : > { %s513_s15 = spop %512 }
 0x1b2   : > { %s401_s16 = sadd.f32 %s513_s15, %s511_s29 }
 0x1b4   : > { %s402_s23 = smul.f32 0.5, %s401_s16 }
 0x1b6   : > { %s403_s24 = sadd.f32 %s402_s23, %s359_s18 }
 0x1b8   : > { %v404_v7 = vstv %s403_s24 }
 0x1b9   : > { %405 = vst [vmem:[#allocation13] sm:$0x1] %v404_v7 }
 0x1ba PF: > { %p530_p12 = scmp.eq.s32.totalorder %s736_s13, 3  ;;  %s701_s25 = smov [#allocation13]  }
 0x1bb   : > { %s412_s26 = sshll.u32 %s701_s25, 4  ;;  %s414_s5 = sshll.u32 %s877_s2, 4  ;;  %s413_s26 = int_to_ptr.vmem [resolvable:$true] %s412_s26  ;;  %s415_s5 = int_to_ptr.hbm [resolvable:$true] %s414_s5 }
 0x1bc   : > { %519 = dma.vmem_to_hbm [thread:$0]  (%p530_p12), %s413_s26, 16, %s415_s5, [#allocation10]  }
 0x1bd   : > { %681 = dma.done.wait (%p530_p12), [#allocation10], 16  }
 0x1be   : > { %683 = vsyncadd (%p530_p12), [#allocation10], 4294967280 }
 0x1bf PF: > { %p16_p2 = scmp.ge.s32.totalorder %s739_s14, 6   ;;  %s882_s9 = smov %s690_s10 }
 0x1c0   : > { %s883_s10 = smov %s694_s11  ;;  %s884_s11 = smov %s749_s17 }
 0x1c1   : > { %s885_s12 = smov %s739_s14  ;;  %18 = sbr.rel (!%p16_p2) target bundleno = 6 (0x6), region = 86 }
 0x1c6   :  { %428 = vsyncpa [#allocation9], 1 }
 0x1c7   :  { %430 = vsyncpa [#allocation9 + $0x1], 1 }
 0x1c8   :  { %431 = vsyncpa [#allocation12], 1 }
 0x1c9   :  { %433 = vsyncpa [#allocation12 + $0x1], 1 }
 0x1ca   :  { %434 = vsyncpa [#allocation10], 1 }
 0x1cb   :  { %436 = vsyncpa [#allocation10 + $0x1], 1 }

</bundles_post_ra>
